<compile_context>
chip_gen: v7x
topology: tpu7x:2x2x1
jax: 0.10.0
libtpu: 0.0.40
codegen_flags: <defaults>
</compile_context>

<pallas_src>
import functools

import jax
import jax.numpy as jnp
from jax.experimental import pallas as pl
from jax.experimental.pallas import tpu as pltpu

_LANE = 128
_NEG_BIG = -1e30


def _cls_kernel(x_ref, w_ref, b_ref, pre_ref, *, before_softmax):
    # x_ref block: (TM, D) rows of the flattened (B*S, D) activations.
    x = x_ref[...]                                  # (TM, D)
    w = w_ref[...]                                  # (D, C_pad)  resident (constant index_map)
    b = b_ref[...]                                  # (1, C_pad)  f32
    logits = jnp.dot(x, w, preferred_element_type=jnp.float32) + b   # (TM, C_pad), f32

    if not before_softmax:
        # Softmax over the class dimension, f32 math.  Padded columns carry a
        # -1e30 bias so exp() of them is exactly 0 and the denominator is clean.
        m = jnp.max(logits, axis=-1, keepdims=True)
        e = jnp.exp(logits - m)
        denom = jnp.sum(e, axis=-1, keepdims=True)
        logits = e / denom

    pre_ref[...] = logits.astype(pre_ref.dtype)


def classification_network_forward(inputs, weight, bias, num_segments,
                                   before_softmax=True, row_tile=1024):
    """inputs: (B*S, D); weight: (D, C); bias: (C,) or (1, C).

    Returns {'logits': (B, C), 'logits_pre': (B, S, C)} matching the PyTorch
    forward (avg consensus, squeeze(1))."""
    n, d = inputs.shape
    assert n % num_segments == 0
    batch = n // num_segments
    c = weight.shape[-1]

    # Lane-dense output: pad the class dim to a multiple of 128 (once, tiny).
    c_pad = pl.cdiv(c, _LANE) * _LANE
    bias = jnp.asarray(bias, dtype=jnp.float32).reshape(1, c)
    if c_pad != c:
        weight = jnp.pad(weight, ((0, 0), (0, c_pad - c)))
        pad_val = 0.0 if before_softmax else _NEG_BIG
        bias = jnp.pad(bias, ((0, 0), (0, c_pad - c)), constant_values=pad_val)

    # Row tile: whole row dim for small inputs, else a large 8-aligned tile.
    # No padded copy of the activations -- the ragged last block is handled by
    # Pallas (garbage OOB rows are sliced off below).
    tm = n if n <= row_tile else row_tile
    grid = (pl.cdiv(n, tm),)

    # Size VMEM to what the kernel actually needs (double-buffered x/out,
    # resident weight+bias) plus headroom; never ask for all of v7x's 64 MiB.
    x_bytes = 2 * tm * d * inputs.dtype.itemsize
    w_bytes = 2 * d * c_pad * weight.dtype.itemsize
    o_bytes = 2 * tm * c_pad * 4
    vmem_limit = int(min(max((x_bytes + w_bytes + o_bytes) * 3 // 2 + (4 << 20),
                             16 << 20), 48 << 20))

    kernel = functools.partial(_cls_kernel, before_softmax=before_softmax)

    pre = pl.pallas_call(
        kernel,
        out_shape=jax.ShapeDtypeStruct((n, c_pad), jnp.float32),
        grid_spec=pltpu.PrefetchScalarGridSpec(
            num_scalar_prefetch=0,
            grid=grid,
            in_specs=[
                pl.BlockSpec((tm, d), lambda i: (i, 0)),       # activation row tile
                pl.BlockSpec((d, c_pad), lambda i: (0, 0)),    # fc_action weight (resident)
                pl.BlockSpec((1, c_pad), lambda i: (0, 0)),    # fc_action bias (resident)
            ],
            out_specs=pl.BlockSpec((tm, c_pad), lambda i: (i, 0)),
        ),
        compiler_params=pltpu.CompilerParams(
            dimension_semantics=("parallel",),     # v7x: shard row tiles across both TCs
            vmem_limit_bytes=vmem_limit,
        ),
    )(inputs, weight, bias)

    pre = pre[:, :c].reshape(batch, num_segments, c)       # drop padded classes -> (B, S, C)
    logits = jnp.mean(pre, axis=1)                         # avg consensus + squeeze(1)
    return {"logits": logits, "logits_pre": pre}


def _reference(inputs, weight, bias, num_segments, before_softmax):
    base = (inputs.astype(jnp.float32) @ weight.astype(jnp.float32)
            + jnp.asarray(bias, jnp.float32).reshape(1, -1))
    if not before_softmax:
        base = jax.nn.softmax(base, axis=-1)
    batch = inputs.shape[0] // num_segments
    pre = base.reshape(batch, num_segments, weight.shape[-1])
    return pre, jnp.mean(pre, axis=1)


if __name__ == "__main__":
    feature_dim = 1024       # single-modality fc_action input dim
    num_class = 32
    std = 0.001

    key = jax.random.PRNGKey(0)
    k_in, k_w, k_in2 = jax.random.split(key, 3)

    # PyTorch Linear weight is (out, in); we keep the transposed (in, out) layout
    # so that y = x @ W + b.  normal_(w, 0, 0.001) / constant_(b, 0).
    fc_action_w = (std * jax.random.normal(k_w, (feature_dim, num_class))).astype(jnp.float32)
    fc_action_b = jnp.zeros((1, num_class), dtype=jnp.float32)

    # --- check 1: small shapes, before_softmax=True, single-tile path ---
    batch, num_segments = 2, 8
    inputs = jax.random.normal(k_in, (batch * num_segments, feature_dim)).astype(jnp.float32)

    result = classification_network_forward(
        inputs, fc_action_w, fc_action_b, num_segments, before_softmax=True)
    jax.block_until_ready(result)

    pre_ref, logits_ref = _reference(inputs, fc_action_w, fc_action_b, num_segments, True)
    assert result["logits_pre"].shape == (batch, num_segments, num_class)
    assert result["logits"].shape == (batch, num_class)
    assert jnp.allclose(result["logits_pre"], pre_ref, atol=1e-5)
    assert jnp.allclose(result["logits"], logits_ref, atol=1e-5)

    # --- check 2: multi-tile ragged path + softmax + padded-class masking ---
    batch2, num_segments2 = 25, 8                 # 200 rows; row_tile=64 -> grid=4, ragged tail
    inputs2 = jax.random.normal(k_in2, (batch2 * num_segments2, feature_dim)).astype(jnp.float32)

    result2 = classification_network_forward(
        inputs2, fc_action_w, fc_action_b, num_segments2,
        before_softmax=False, row_tile=64)
    jax.block_until_ready(result2)

    pre_ref2, logits_ref2 = _reference(inputs2, fc_action_w, fc_action_b, num_segments2, False)
    assert result2["logits_pre"].shape == (batch2, num_segments2, num_class)
    assert result2["logits"].shape == (batch2, num_class)
    assert jnp.allclose(result2["logits_pre"], pre_ref2, atol=1e-5)
    assert jnp.allclose(result2["logits"], logits_ref2, atol=1e-5)

    # --- check 3: bf16 activations/weights (halves the dominant HBM x stream) ---
    inputs_bf = inputs.astype(jnp.bfloat16)
    w_bf = fc_action_w.astype(jnp.bfloat16)
    result3 = classification_network_forward(
        inputs_bf, w_bf, fc_action_b, num_segments, before_softmax=True)
    jax.block_until_ready(result3)
    pre_ref3, logits_ref3 = _reference(inputs_bf, w_bf, fc_action_b, num_segments, True)
    assert jnp.allclose(result3["logits_pre"], pre_ref3, atol=1e-3)
    assert jnp.allclose(result3["logits"], logits_ref3, atol=1e-3)

    print("KERNEL_OK")
</pallas_src>

<mosaic_0001>
module attributes {stable_mosaic.version = 11 : i64} {
  func.func @_cls_kernel(%arg0: i32, %arg1: memref<16x1024xf32, #tpu.memory_space<vmem>>, %arg2: memref<1024x128xf32, #tpu.memory_space<vmem>>, %arg3: memref<1x128xf32, #tpu.memory_space<vmem>>, %arg4: memref<16x128xf32, #tpu.memory_space<vmem>>) attributes {dimension_semantics = [#tpu.dimension_semantics<parallel>], iteration_bounds = array<i64: 1>, scalar_prefetch = 0 : i64, scratch_operands = 0 : i64, tpu.core_type = #tpu.core_type<tc>, window_params = [{transform_indices = @transform_0, window_bounds = array<i64: 16, 1024>}, {pipeline_mode = #tpu.pipeline_mode<synchronous>, transform_indices = @transform_1, window_bounds = array<i64: 1024, 128>}, {pipeline_mode = #tpu.pipeline_mode<synchronous>, transform_indices = @transform_2, window_bounds = array<i64: 1, 128>}, {transform_indices = @transform_3, window_bounds = array<i64: 16, 128>}]} {
    %c0 = arith.constant 0 : index
    %c0_0 = arith.constant 0 : index
    %0 = vector.load %arg1[%c0, %c0_0] : memref<16x1024xf32, #tpu.memory_space<vmem>>, vector<16x1024xf32>
    %c0_1 = arith.constant 0 : index
    %c0_2 = arith.constant 0 : index
    %1 = vector.load %arg2[%c0_1, %c0_2] : memref<1024x128xf32, #tpu.memory_space<vmem>>, vector<1024x128xf32>
    %c0_3 = arith.constant 0 : index
    %c0_4 = arith.constant 0 : index
    %2 = vector.load %arg3[%c0_3, %c0_4] : memref<1x128xf32, #tpu.memory_space<vmem>>, vector<1x128xf32>
    %cst = arith.constant dense<0.000000e+00> : vector<16x128xf32>
    %3 = tpu.matmul %0, %1, %cst {dimension_numbers = #tpu.dot_dimension_numbers<[1], [0], [0], [1], [0, 0, 1, 1], [], []>} : vector<16x1024xf32>, vector<1024x128xf32>, vector<16x128xf32> -> vector<16x128xf32>
    %4 = vector.broadcast %2 : vector<1x128xf32> to vector<16x128xf32>
    %5 = arith.addf %3, %4 : vector<16x128xf32>
    %c0_5 = arith.constant 0 : index
    %c0_6 = arith.constant 0 : index
    %6 = vector.load %arg4[%c0_5, %c0_6] : memref<16x128xf32, #tpu.memory_space<vmem>>, vector<16x128xf32>
    tpu.vector_store %arg4[%c0_5, %c0_6], %5 {strides = array<i32>} : memref<16x128xf32, #tpu.memory_space<vmem>>, vector<16x128xf32>,
    return
  }
  func.func @transform_0(%arg0: i32) -> (i32, i32) {
    %c0_i32 = arith.constant 0 : i32
    %c0_i32_0 = arith.constant 0 : i32
    return %arg0, %c0_i32 : i32, i32
  }
  func.func @transform_1(%arg0: i32) -> (i32, i32) {
    %c0_i32 = arith.constant 0 : i32
    %c0_i32_0 = arith.constant 0 : i32
    %c0_i32_1 = arith.constant 0 : i32
    return %c0_i32, %c0_i32_0 : i32, i32
  }
  func.func @transform_2(%arg0: i32) -> (i32, i32) {
    %c0_i32 = arith.constant 0 : i32
    %c0_i32_0 = arith.constant 0 : i32
    %c0_i32_1 = arith.constant 0 : i32
    return %c0_i32, %c0_i32_0 : i32, i32
  }
  func.func @transform_3(%arg0: i32) -> (i32, i32) {
    %c0_i32 = arith.constant 0 : i32
    %c0_i32_0 = arith.constant 0 : i32
    return %arg0, %c0_i32 : i32, i32
  }
}

</mosaic_0001>

<bundles_post_ra>
// kernel: tpu_custom_call.1
= control target key start
LH: loop header
LB: loop body
LE: loop exit
PB: predicated region body
PF: predicated region fallthrough
CT: control target
= control target key end

     0   :  { %8 = vsyncpa [#allocation3], 0  ;;  %s946_s0 = inlined_call_operand.hbm [shape: f32[16,1024], index: 0, kind: input, shape index: {}]   ;;  %s947_s1 = inlined_call_operand.hbm [shape: f32[1024,128], index: 1, kind: input, shape index: {}]   ;;  %s948_s2 = inlined_call_operand.vmem [shape: f32[1,128], index: 2, kind: input, shape index: {}]   ;;  %s949_s3 = inlined_call_operand.hbm [shape: f32[16,128], index: 3, kind: output, shape index: {}]  }
   0x1   :  { %9 = vsyncpa [#allocation6], 0 }
   0x2   :  { %10 = vsyncpa [#allocation4], 0  ;;  %s874_s12 = smov [#allocation2]   ;;  %s802_s16 = scalar_lea.hbm %s946_s0, 2048 }
   0x3   :  { %s16_s13 = sshll.u32 %s874_s12, 4  ;;  %p803_p0 = scmp.ne.s32.totalorder %s946_s0, %s802_s16  ;;  %s17_s13 = int_to_ptr.vmem [resolvable:$true] %s16_s13 }
   0x4   :  { %p806_p1 = scmp.lt.u32.totalorder %s802_s16, %s946_s0 }
   0x6   :  { %p808_p2 = pnand %p806_p1, %p803_p0 }
   0x8   :  { %811 = shalt.err (!%p808_p2)
}
   0x9   :  { %s812_s21 = scalar_lea.vmem %s17_s13, 2048  ;;  %p817_p4 = scmp.lt.s32.totalorder %s17_s13, %s17_s13 }
   0xa   :  { %p813_p3 = scmp.ne.s32.totalorder %s17_s13, %s812_s21  ;;  %p818_p5 = scmp.lt.s32.totalorder %s812_s21, %s812_s21 }
   0xc   :  { %p819_p6 = por %p818_p5, %p817_p4 }
   0xe   :  { %p820_p7 = pnand %p819_p6, %p813_p3 }
  0x10   :  { %823 = shalt.err (!%p820_p7)
}
  0x11   :  { %s875_s22 = smov 1024   ;;  %s876_s23 = smov 64  }
  0x12   :  { %22 = dma.hbm_to_vmem [thread:$0]  %s946_s0, 2048, %s17_s13, [#allocation3], %s875_s22, %s875_s22, %s876_s23  }
  0x13   :  { %s877_s26 = smov [#allocation5]   ;;  %s824_s30 = scalar_lea.hbm %s947_s1, 16384 }
  0x14   :  { %s28_s27 = sshll.u32 %s877_s26, 4  ;;  %p825_p8 = scmp.ne.s32.totalorder %s947_s1, %s824_s30  ;;  %s29_s27 = int_to_ptr.vmem [resolvable:$true] %s28_s27 }
  0x15   :  { %p828_p9 = scmp.lt.u32.totalorder %s824_s30, %s947_s1 }
  0x17   :  { %p830_p10 = pnand %p828_p9, %p825_p8 }
  0x19   :  { %833 = shalt.err (!%p830_p10)
}
  0x1a   :  { %s834_s8 = scalar_lea.vmem %s29_s27, 16384  ;;  %p839_p12 = scmp.lt.s32.totalorder %s29_s27, %s29_s27 }
  0x1b   :  { %p835_p11 = scmp.ne.s32.totalorder %s29_s27, %s834_s8  ;;  %p840_p13 = scmp.lt.s32.totalorder %s834_s8, %s834_s8 }
  0x1d   :  { %p841_p0 = por %p840_p13, %p839_p12 }
  0x1f   :  { %p842_p1 = pnand %p841_p0, %p835_p11 }
  0x21   :  { %845 = shalt.err (!%p842_p1)
}
  0x22   :  { %s878_s0 = smov 128   ;;  %s879_s9 = smov 8  }
  0x23   :  { %34 = dma.hbm_to_vmem [thread:$0]  %s947_s1, 16384, %s29_s27, [#allocation6], %s878_s0, %s878_s0, %s879_s9  }
  0x24   :  { %868 = dma.done.wait [#allocation3], 2048  }
  0x25   :  { %869 = vsyncadd [#allocation3], 4294965248 }
  0x26   :  { %870 = dma.done.wait [#allocation6], 16384  }
  0x27   :  { %871 = vsyncadd [#allocation6], 4294950912  ;;  %v75_v0 = vld [vmem:[#allocation5 + $0x80] sm:$0xff]  ;;  %v76_v1 = vld [vmem:[#allocation5 + $0x88] sm:$0xff] }
  0x28   :  { %v59_v2 = vld [vmem:[#allocation5] sm:$0xff]  ;;  %v667_v3 = vpack.c.bf16 %v76_v1, %v75_v0  ;;  %v60_v4 = vld [vmem:[#allocation5 + $0x8] sm:$0xff]  ;;  %v77_v11 = vld [vmem:[#allocation5 + $0x90] sm:$0xff] }
  0x29   :  { %v107_v5 = vld [vmem:[#allocation5 + $0x180] sm:$0xff]  ;;  %v108_v6 = vld [vmem:[#allocation5 + $0x188] sm:$0xff]  ;;  %v669_v7 = vpack.c.bf16 %v60_v4, %v59_v2  ;;  %v78_v13 = vld [vmem:[#allocation5 + $0x98] sm:$0xff] }
  0x2a   :  { %v699_v8 = vpack.c.bf16 %v108_v6, %v107_v5  ;;  %v91_v9 = vld [vmem:[#allocation5 + $0x100] sm:$0xff]  ;;  %v92_v10 = vld [vmem:[#allocation5 + $0x108] sm:$0xff]  ;;  %668 = vmatprep.subr.bf16.mxu0 %v667_v3  ;;  %v61_v14 = vld [vmem:[#allocation5 + $0x10] sm:$0xff]  ;;  %v671_v16 = vpack.c.bf16 %v78_v13, %v77_v11 }
  0x2b   :  { %v701_v12 = vpack.c.bf16 %v92_v10, %v91_v9  ;;  %v62_v15 = vld [vmem:[#allocation5 + $0x18] sm:$0xff]  ;;  %670 = vmatpush3.bf16.msra.mxu0 %v669_v7  ;;  %v109_v18 = vld [vmem:[#allocation5 + $0x190] sm:$0xff]  ;;  %v79_v23 = vld [vmem:[#allocation5 + $0xa0] sm:$0xff] }
  0x2c   :  { %700 = vmatprep.subr.bf16.mxu1 %v699_v8  ;;  %v673_v17 = vpack.c.bf16 %v62_v15, %v61_v14  ;;  %v110_v19 = vld [vmem:[#allocation5 + $0x198] sm:$0xff]  ;;  %v93_v20 = vld [vmem:[#allocation5 + $0x110] sm:$0xff]  ;;  %v80_v24 = vld [vmem:[#allocation5 + $0xa8] sm:$0xff]  ;;  %672 = vmatprep.subr.bf16.mxu0 %v671_v16 }
  0x2d   :  { %702 = vmatpush3.bf16.msra.mxu1 %v701_v12  ;;  %v703_v21 = vpack.c.bf16 %v110_v19, %v109_v18  ;;  %v94_v22 = vld [vmem:[#allocation5 + $0x118] sm:$0xff]  ;;  %v675_v26 = vpack.c.bf16 %v80_v24, %v79_v23  ;;  %v63_v27 = vld [vmem:[#allocation5 + $0x20] sm:$0xff]  ;;  %v64_v28 = vld [vmem:[#allocation5 + $0x28] sm:$0xff] }
  0x2e   :  { %v705_v25 = vpack.c.bf16 %v94_v22, %v93_v20  ;;  %v111_v29 = vld [vmem:[#allocation5 + $0x1a0] sm:$0xff]  ;;  %v112_v30 = vld [vmem:[#allocation5 + $0x1a8] sm:$0xff]  ;;  %v677_v33 = vpack.c.bf16 %v64_v28, %v63_v27  ;;  %v81_v35 = vld [vmem:[#allocation5 + $0xb0] sm:$0xff] }
  0x2f   :  { %704 = vmatprep.subr.bf16.mxu1 %v703_v21  ;;  %v95_v31 = vld [vmem:[#allocation5 + $0x120] sm:$0xff]  ;;  %v96_v32 = vld [vmem:[#allocation5 + $0x128] sm:$0xff]  ;;  %674 = vmatpush3.bf16.msra.mxu0 %v673_v17  ;;  %v707_v34 = vpack.c.bf16 %v112_v30, %v111_v29  ;;  %v82_v36 = vld [vmem:[#allocation5 + $0xb8] sm:$0xff] }
  0x30   :  { %v65_v37 = vld [vmem:[#allocation5 + $0x30] sm:$0xff]  ;;  %676 = vmatprep.subr.bf16.mxu0 %v675_v26  ;;  %v709_v38 = vpack.c.bf16 %v96_v32, %v95_v31  ;;  %v679_v39 = vpack.c.bf16 %v82_v36, %v81_v35  ;;  %v66_v40 = vld [vmem:[#allocation5 + $0x38] sm:$0xff]  ;;  %v83_v46 = vld [vmem:[#allocation5 + $0xc0] sm:$0xff] }
  0x31   :  { %706 = vmatpush3.bf16.msra.mxu1 %v705_v25  ;;  %v113_v41 = vld [vmem:[#allocation5 + $0x1b0] sm:$0xff]  ;;  %v114_v42 = vld [vmem:[#allocation5 + $0x1b8] sm:$0xff]  ;;  %v84_v47 = vld [vmem:[#allocation5 + $0xc8] sm:$0xff]  ;;  %v681_v48 = vpack.c.bf16 %v66_v40, %v65_v37 }
  0x32   :  { %708 = vmatprep.subr.bf16.mxu1 %v707_v34  ;;  %v711_v43 = vpack.c.bf16 %v114_v42, %v113_v41  ;;  %v97_v44 = vld [vmem:[#allocation5 + $0x130] sm:$0xff]  ;;  %v98_v45 = vld [vmem:[#allocation5 + $0x138] sm:$0xff]  ;;  %v115_v49 = vld [vmem:[#allocation5 + $0x1c0] sm:$0xff]  ;;  %v683_v52 = vpack.c.bf16 %v84_v47, %v83_v46 }
  0x33   :  { %678 = vmatpush3.bf16.msra.mxu0 %v677_v33  ;;  %v116_v50 = vld [vmem:[#allocation5 + $0x1c8] sm:$0xff]  ;;  %v713_v51 = vpack.c.bf16 %v98_v45, %v97_v44  ;;  %v67_v53 = vld [vmem:[#allocation5 + $0x40] sm:$0xff]  ;;  %v85_v58 = vld [vmem:[#allocation5 + $0xd0] sm:$0xff] }
  0x34   :  { %680 = vmatprep.subr.bf16.mxu0 %v679_v39  ;;  %v68_v54 = vld [vmem:[#allocation5 + $0x48] sm:$0xff]  ;;  %v99_v55 = vld [vmem:[#allocation5 + $0x140] sm:$0xff]  ;;  %v715_v56 = vpack.c.bf16 %v116_v50, %v115_v49  ;;  %v86_v59 = vld [vmem:[#allocation5 + $0xd8] sm:$0xff] }
  0x35   :  { %710 = vmatpush3.bf16.msra.mxu1 %v709_v38  ;;  %v100_v57 = vld [vmem:[#allocation5 + $0x148] sm:$0xff]  ;;  %v117_v60 = vld [vmem:[#allocation5 + $0x1d0] sm:$0xff]  ;;  %v118_v61 = vld [vmem:[#allocation5 + $0x1d8] sm:$0xff]  ;;  %v685_v62 = vpack.c.bf16 %v68_v54, %v67_v53  ;;  %v687_v0 = vpack.c.bf16 %v86_v59, %v85_v58 }
  0x36   :  { %712 = vmatprep.subr.bf16.mxu1 %v711_v43  ;;  %v717_v63 = vpack.c.bf16 %v100_v57, %v99_v55  ;;  %v69_v1 = vld [vmem:[#allocation5 + $0x50] sm:$0xff]  ;;  %v70_v2 = vld [vmem:[#allocation5 + $0x58] sm:$0xff]  ;;  %v719_v4 = vpack.c.bf16 %v118_v61, %v117_v60  ;;  %v87_v6 = vld [vmem:[#allocation5 + $0xe0] sm:$0xff] }
  0x37   :  { %682 = vmatpush3.bf16.msra.mxu0 %v681_v48  ;;  %v101_v3 = vld [vmem:[#allocation5 + $0x150] sm:$0xff]  ;;  %v102_v5 = vld [vmem:[#allocation5 + $0x158] sm:$0xff]  ;;  %v88_v7 = vld [vmem:[#allocation5 + $0xe8] sm:$0xff]  ;;  %v689_v10 = vpack.c.bf16 %v70_v2, %v69_v1 }
  0x38   :  { %684 = vmatprep.subr.bf16.mxu0 %v683_v52  ;;  %v119_v8 = vld [vmem:[#allocation5 + $0x1e0] sm:$0xff]  ;;  %v120_v9 = vld [vmem:[#allocation5 + $0x1e8] sm:$0xff]  ;;  %v721_v13 = vpack.c.bf16 %v102_v5, %v101_v3  ;;  %v691_v14 = vpack.c.bf16 %v88_v7, %v87_v6  ;;  %v89_v19 = vld [vmem:[#allocation5 + $0xf0] sm:$0xff] }
  0x39   :  { %714 = vmatpush3.bf16.msra.mxu1 %v713_v51  ;;  %v71_v11 = vld [vmem:[#allocation5 + $0x60] sm:$0xff]  ;;  %v72_v12 = vld [vmem:[#allocation5 + $0x68] sm:$0xff]  ;;  %v723_v18 = vpack.c.bf16 %v120_v9, %v119_v8  ;;  %v90_v20 = vld [vmem:[#allocation5 + $0xf8] sm:$0xff] }
  0x3a   :  { %716 = vmatprep.subr.bf16.mxu1 %v715_v56  ;;  %v103_v15 = vld [vmem:[#allocation5 + $0x160] sm:$0xff]  ;;  %v104_v16 = vld [vmem:[#allocation5 + $0x168] sm:$0xff]  ;;  %v46_v21 = vld [vmem:[#allocation2 + $0x18] sm:$0xff]  ;;  %v693_v24 = vpack.c.bf16 %v72_v12, %v71_v11  ;;  %v695_v26 = vpack.c.bf16 %v90_v20, %v89_v19 }
  0x3b   :  { %686 = vmatpush3.bf16.msra.mxu0 %v685_v62  ;;  %v44_v17 = vld [vmem:[#allocation2 + $0x8] sm:$0xff]  ;;  %v121_v22 = vld [vmem:[#allocation5 + $0x1f0] sm:$0xff]  ;;  %v122_v23 = vld [vmem:[#allocation5 + $0x1f8] sm:$0xff]  ;;  %333 = vmatprep.mubr.f32.mxu1 %v46_v21  ;;  %v725_v25 = vpack.c.bf16 %v104_v16, %v103_v15 }
  0x3c   :  { %688 = vmatprep.subr.bf16.mxu0 %v687_v0  ;;  %258 = vmatprep.mubr.f32.mxu0 %v44_v17  ;;  %v73_v27 = vld [vmem:[#allocation5 + $0x70] sm:$0xff]  ;;  %v74_v28 = vld [vmem:[#allocation5 + $0x78] sm:$0xff]  ;;  %v727_v30 = vpack.c.bf16 %v122_v23, %v121_v22  ;;  %v139_v32 = vld [vmem:[#allocation5 + $0x280] sm:$0xff] }
  0x3d   :  { %718 = vmatpush3.bf16.msra.mxu1 %v717_v63  ;;  %v105_v29 = vld [vmem:[#allocation5 + $0x170] sm:$0xff]  ;;  %v106_v31 = vld [vmem:[#allocation5 + $0x178] sm:$0xff]  ;;  %v140_v33 = vld [vmem:[#allocation5 + $0x288] sm:$0xff]  ;;  %v697_v36 = vpack.c.bf16 %v74_v28, %v73_v27 }
  0x3e   :  { %720 = vmatprep.subr.bf16.mxu1 %v719_v4  ;;  %v171_v34 = vld [vmem:[#allocation5 + $0x380] sm:$0xff]  ;;  %v172_v35 = vld [vmem:[#allocation5 + $0x388] sm:$0xff]  ;;  %v729_v37 = vpack.c.bf16 %v106_v31, %v105_v29  ;;  %v731_v38 = vpack.c.bf16 %v140_v33, %v139_v32  ;;  %v141_v44 = vld [vmem:[#allocation5 + $0x290] sm:$0xff] }
  0x3f   :  { %690 = vmatpush3.bf16.msra.mxu0 %v689_v10  ;;  %v123_v39 = vld [vmem:[#allocation5 + $0x200] sm:$0xff]  ;;  %v124_v40 = vld [vmem:[#allocation5 + $0x208] sm:$0xff]  ;;  %v763_v42 = vpack.c.bf16 %v172_v35, %v171_v34  ;;  %v142_v45 = vld [vmem:[#allocation5 + $0x298] sm:$0xff] }
  0x40   :  { %692 = vmatprep.subr.bf16.mxu0 %v691_v14  ;;  %v155_v41 = vld [vmem:[#allocation5 + $0x300] sm:$0xff]  ;;  %v156_v43 = vld [vmem:[#allocation5 + $0x308] sm:$0xff]  ;;  %v173_v46 = vld [vmem:[#allocation5 + $0x390] sm:$0xff]  ;;  %v733_v49 = vpack.c.bf16 %v124_v40, %v123_v39  ;;  %v735_v52 = vpack.c.bf16 %v142_v45, %v141_v44 }
  0x41   :  { %722 = vmatpush3.bf16.msra.mxu1 %v721_v13  ;;  %v174_v47 = vld [vmem:[#allocation5 + $0x398] sm:$0xff]  ;;  %v43_v48 = vld [vmem:[#allocation2] sm:$0xff]  ;;  %v45_v50 = vld [vmem:[#allocation2 + $0x10] sm:$0xff]  ;;  %v765_v51 = vpack.c.bf16 %v156_v43, %v155_v41 }
  0x42   :  { %724 = vmatprep.subr.bf16.mxu1 %v723_v18  ;;  %v125_v53 = vld [vmem:[#allocation5 + $0x210] sm:$0xff]  ;;  %v126_v54 = vld [vmem:[#allocation5 + $0x218] sm:$0xff]  ;;  %v767_v56 = vpack.c.bf16 %v174_v47, %v173_v46  ;;  %v143_v58 = vld [vmem:[#allocation5 + $0x2a0] sm:$0xff] }
  0x43   :  { %694 = vmatpush3.bf16.msra.mxu0 %v693_v24  ;;  %v157_v55 = vld [vmem:[#allocation5 + $0x310] sm:$0xff]  ;;  %v158_v57 = vld [vmem:[#allocation5 + $0x318] sm:$0xff]  ;;  %v144_v59 = vld [vmem:[#allocation5 + $0x2a8] sm:$0xff]  ;;  %v737_v62 = vpack.c.bf16 %v126_v54, %v125_v53 }
  0x44   :  { %696 = vmatprep.subr.bf16.mxu0 %v695_v26  ;;  %v175_v60 = vld [vmem:[#allocation5 + $0x3a0] sm:$0xff]  ;;  %v176_v61 = vld [vmem:[#allocation5 + $0x3a8] sm:$0xff]  ;;  %v769_v63 = vpack.c.bf16 %v158_v57, %v157_v55  ;;  %v739_v0 = vpack.c.bf16 %v144_v59, %v143_v58  ;;  %v145_v6 = vld [vmem:[#allocation5 + $0x2b0] sm:$0xff] }
  0x45   :  { %726 = vmatpush3.bf16.msra.mxu1 %v725_v25  ;;  %v127_v1 = vld [vmem:[#allocation5 + $0x220] sm:$0xff]  ;;  %v128_v2 = vld [vmem:[#allocation5 + $0x228] sm:$0xff]  ;;  %v771_v4 = vpack.c.bf16 %v176_v61, %v175_v60  ;;  %v146_v7 = vld [vmem:[#allocation5 + $0x2b8] sm:$0xff] }
  0x46   :  { %728 = vmatprep.subr.bf16.mxu1 %v727_v30  ;;  %v159_v3 = vld [vmem:[#allocation5 + $0x320] sm:$0xff]  ;;  %v160_v5 = vld [vmem:[#allocation5 + $0x328] sm:$0xff]  ;;  %v177_v8 = vld [vmem:[#allocation5 + $0x3b0] sm:$0xff]  ;;  %v741_v10 = vpack.c.bf16 %v128_v2, %v127_v1  ;;  %v743_v15 = vpack.c.bf16 %v146_v7, %v145_v6 }
  0x47   :  { %698 = vmatpush3.bf16.msra.mxu0 %v697_v36  ;;  %v178_v9 = vld [vmem:[#allocation5 + $0x3b8] sm:$0xff]  ;;  %v129_v11 = vld [vmem:[#allocation5 + $0x230] sm:$0xff]  ;;  %v52_v13 = vld [vmem:[#allocation2 + $0x48] sm:$0xff]  ;;  %v773_v14 = vpack.c.bf16 %v160_v5, %v159_v3 }
  0x48   :  { %732 = vmatprep.subr.bf16.mxu0 %v731_v38  ;;  %v130_v12 = vld [vmem:[#allocation5 + $0x238] sm:$0xff]  ;;  %v161_v16 = vld [vmem:[#allocation5 + $0x330] sm:$0xff]  ;;  %v51_v18 = vld [vmem:[#allocation2 + $0x40] sm:$0xff]  ;;  %v775_v19 = vpack.c.bf16 %v178_v9, %v177_v8 }
  0x49   :  { %730 = vmatpush3.bf16.msra.mxu1 %v729_v37  ;;  %v162_v17 = vld [vmem:[#allocation5 + $0x338] sm:$0xff]  ;;  %v147_v20 = vld [vmem:[#allocation5 + $0x2c0] sm:$0xff]  ;;  %v148_v21 = vld [vmem:[#allocation5 + $0x2c8] sm:$0xff]  ;;  %v745_v26 = vpack.c.bf16 %v130_v12, %v129_v11 }
  0x4a   :  { %764 = vmatprep.subr.bf16.mxu1 %v763_v42  ;;  %259 = vmatmul.mubr.f32.vlgmr.msra.gmra.mrb[0].mxu0 %v43_v48  ;;  %v54_v22 = vld [vmem:[#allocation2 + $0x58] sm:$0xff]  ;;  %v179_v23 = vld [vmem:[#allocation5 + $0x3c0] sm:$0xff]  ;;  %v180_v24 = vld [vmem:[#allocation5 + $0x3c8] sm:$0xff]  ;;  %v777_v29 = vpack.c.bf16 %v162_v17, %v161_v16  ;;  %v747_v30 = vpack.c.bf16 %v148_v21, %v147_v20 }
  0x4b   :  { %734 = vmatpush3.bf16.msra.mxu0 %v733_v49  ;;  %263 = vmatprep.mubr.f32.mxu0 %v52_v13  ;;  %v53_v25 = vld [vmem:[#allocation2 + $0x50] sm:$0xff]  ;;  %v131_v27 = vld [vmem:[#allocation5 + $0x240] sm:$0xff]  ;;  %v132_v28 = vld [vmem:[#allocation5 + $0x248] sm:$0xff]  ;;  %v779_v34 = vpack.c.bf16 %v180_v24, %v179_v23 }
  0x4c   :  { %334 = vmatmul.mubr.f32.vlgmr.msra.gmra.mrb[0].mxu1 %v45_v50  ;;  %736 = vmatprep.subr.bf16.mxu0 %v735_v52  ;;  %v163_v31 = vld [vmem:[#allocation5 + $0x340] sm:$0xff]  ;;  %v164_v32 = vld [vmem:[#allocation5 + $0x348] sm:$0xff]  ;;  %v149_v35 = vld [vmem:[#allocation5 + $0x2d0] sm:$0xff]  ;;  %v749_v40 = vpack.c.bf16 %v132_v28, %v131_v27 }
  0x4d   :  { %766 = vmatpush3.bf16.msra.mxu1 %v765_v51  ;;  %338 = vmatprep.mubr.f32.mxu1 %v54_v22  ;;  %v48_v33 = vld [vmem:[#allocation2 + $0x28] sm:$0xff]  ;;  %v150_v36 = vld [vmem:[#allocation5 + $0x2d8] sm:$0xff]  ;;  %v181_v38 = vld [vmem:[#allocation5 + $0x3d0] sm:$0xff]  ;;  %v781_v41 = vpack.c.bf16 %v164_v32, %v163_v31 }
  0x4e   :  { %768 = vmatprep.subr.bf16.mxu1 %v767_v56  ;;  %264 = vmatmul.mubr.f32.gmra.mrb[2].mxu0 %v51_v18  ;;  %v50_v37 = vld [vmem:[#allocation2 + $0x38] sm:$0xff]  ;;  %v751_v42 = vpack.c.bf16 %v150_v36, %v149_v35  ;;  %v133_v43 = vld [vmem:[#allocation5 + $0x250] sm:$0xff]  ;;  %v151_v48 = vld [vmem:[#allocation5 + $0x2e0] sm:$0xff] }
  0x4f   :  { %738 = vmatpush3.bf16.msra.mxu0 %v737_v62  ;;  %408 = vmatprep.mubr.f32.mxu0 %v48_v33  ;;  %v182_v39 = vld [vmem:[#allocation5 + $0x3d8] sm:$0xff]  ;;  %v165_v45 = vld [vmem:[#allocation5 + $0x350] sm:$0xff]  ;;  %v152_v49 = vld [vmem:[#allocation5 + $0x2e8] sm:$0xff] }
  0x50   :  { %740 = vmatprep.subr.bf16.mxu0 %v739_v0  ;;  %339 = vmatmul.mubr.f32.gmra.mrb[2].mxu1 %v53_v25  ;;  %v134_v44 = vld [vmem:[#allocation5 + $0x258] sm:$0xff]  ;;  %v783_v46 = vpack.c.bf16 %v182_v39, %v181_v38  ;;  %v183_v50 = vld [vmem:[#allocation5 + $0x3e0] sm:$0xff]  ;;  %v184_v51 = vld [vmem:[#allocation5 + $0x3e8] sm:$0xff]  ;;  %v755_v54 = vpack.c.bf16 %v152_v49, %v151_v48 }
  0x51   :  { %770 = vmatpush3.bf16.msra.mxu1 %v769_v63  ;;  %483 = vmatprep.mubr.f32.mxu1 %v50_v37  ;;  %v166_v47 = vld [vmem:[#allocation5 + $0x358] sm:$0xff]  ;;  %v753_v52 = vpack.c.bf16 %v134_v44, %v133_v43  ;;  %v135_v55 = vld [vmem:[#allocation5 + $0x260] sm:$0xff]  ;;  %v136_v56 = vld [vmem:[#allocation5 + $0x268] sm:$0xff]  ;;  %v787_v58 = vpack.c.bf16 %v184_v51, %v183_v50 }
  0x52   :  { %772 = vmatprep.subr.bf16.mxu1 %v771_v4  ;;  %v785_v53 = vpack.c.bf16 %v166_v47, %v165_v45  ;;  %v167_v57 = vld [vmem:[#allocation5 + $0x360] sm:$0xff]  ;;  %v168_v59 = vld [vmem:[#allocation5 + $0x368] sm:$0xff]  ;;  %v153_v60 = vld [vmem:[#allocation5 + $0x2f0] sm:$0xff]  ;;  %v757_v0 = vpack.c.bf16 %v136_v56, %v135_v55 }
  0x53   :  { %742 = vmatpush3.bf16.msra.mxu0 %v741_v10  ;;  %v154_v61 = vld [vmem:[#allocation5 + $0x2f8] sm:$0xff]  ;;  %v185_v62 = vld [vmem:[#allocation5 + $0x3f0] sm:$0xff]  ;;  %v789_v1 = vpack.c.bf16 %v168_v59, %v167_v57  ;;  %v47_v10 = vld [vmem:[#allocation2 + $0x20] sm:$0xff] }
  0x54   :  { %744 = vmatprep.subr.bf16.mxu0 %v743_v15  ;;  %v186_v63 = vld [vmem:[#allocation5 + $0x3f8] sm:$0xff]  ;;  %v759_v2 = vpack.c.bf16 %v154_v61, %v153_v60  ;;  %v137_v3 = vld [vmem:[#allocation5 + $0x270] sm:$0xff]  ;;  %v56_v12 = vld [vmem:[#allocation2 + $0x68] sm:$0xff] }
  0x55   :  { %774 = vmatpush3.bf16.msra.mxu1 %v773_v14  ;;  %v138_v4 = vld [vmem:[#allocation5 + $0x278] sm:$0xff]  ;;  %v791_v5 = vpack.c.bf16 %v186_v63, %v185_v62  ;;  %v169_v6 = vld [vmem:[#allocation5 + $0x370] sm:$0xff]  ;;  %v55_v14 = vld [vmem:[#allocation2 + $0x60] sm:$0xff] }
  0x56   :  { %776 = vmatprep.subr.bf16.mxu1 %v775_v19  ;;  %v170_v7 = vld [vmem:[#allocation5 + $0x378] sm:$0xff]  ;;  %v761_v8 = vpack.c.bf16 %v138_v4, %v137_v3  ;;  %v49_v11 = vld [vmem:[#allocation2 + $0x30] sm:$0xff]  ;;  %v514_v17 = vld [vmem:[%s948_s2] ss:$0 sm:$0xff]  ;;  %s880_s2 = smov [#allocation7]  }
  0x57   :  { %746 = vmatpush3.bf16.msra.mxu0 %v745_v26  ;;  %v793_v9 = vpack.c.bf16 %v170_v7, %v169_v6  ;;  %v58_v13 = vld [vmem:[#allocation2 + $0x78] sm:$0xff]  ;;  %v57_v15 = vld [vmem:[#allocation2 + $0x70] sm:$0xff]  ;;  %s501_s13 = sshll.u32 %s880_s2, 4  ;;  %s502_s13 = int_to_ptr.vmem [resolvable:$true] %s501_s13 }
  0x58   :  { %748 = vmatprep.subr.bf16.mxu0 %v747_v30  ;;  %s846_s14 = scalar_lea.vmem %s502_s13, 256  ;;  %p851_p3 = scmp.lt.s32.totalorder %s502_s13, %s502_s13 }
  0x59   :  { %778 = vmatpush3.bf16.msra.mxu1 %v777_v29  ;;  %p847_p2 = scmp.ne.s32.totalorder %s502_s13, %s846_s14  ;;  %p852_p4 = scmp.lt.s32.totalorder %s846_s14, %s846_s14 }
  0x5a   :  { %780 = vmatprep.subr.bf16.mxu1 %v779_v34 }
  0x5b   :  { %750 = vmatpush3.bf16.msra.mxu0 %v749_v40  ;;  %p853_p5 = por %p852_p4, %p851_p3 }
  0x5c   :  { %752 = vmatprep.subr.bf16.mxu0 %v751_v42 }
  0x5d   :  { %782 = vmatpush3.bf16.msra.mxu1 %v781_v41  ;;  %p854_p6 = pnand %p853_p5, %p847_p2 }
  0x5e   :  { %784 = vmatprep.subr.bf16.mxu1 %v783_v46 }
  0x5f   :  { %754 = vmatpush3.bf16.msra.mxu0 %v753_v52 }
  0x60   :  { %756 = vmatprep.subr.bf16.mxu0 %v755_v54 }
  0x61   :  { %786 = vmatpush3.bf16.msra.mxu1 %v785_v53 }
  0x62   :  { %788 = vmatprep.subr.bf16.mxu1 %v787_v58 }
  0x63   :  { %758 = vmatpush3.bf16.msra.mxu0 %v757_v0 }
  0x64   :  { %760 = vmatprep.subr.bf16.mxu0 %v759_v2 }
  0x65   :  { %790 = vmatpush3.bf16.msra.mxu1 %v789_v1 }
  0x66   :  { %792 = vmatprep.subr.bf16.mxu1 %v791_v5 }
  0x67   :  { %762 = vmatpush3.bf16.msra.mxu0 %v761_v8 }
  0x69   :  { %794 = vmatpush3.bf16.msra.mxu1 %v793_v9 }
  0x6a   :  { %409 = vmatmul.mubr.f32.vlgmr.msra.gmra.mrb[4].mxu0 %v47_v10 }
  0x6b   :  { %413 = vmatprep.mubr.f32.mxu0 %v56_v12 }
  0x6c   :  { %484 = vmatmul.mubr.f32.vlgmr.msra.gmra.mrb[4].mxu1 %v49_v11 }
  0x6d   :  { %488 = vmatprep.mubr.f32.mxu1 %v58_v13 }
  0x6e   :  { %414 = vmatmul.mubr.f32.gmra.mrb[6].mxu0 %v55_v14 }
  0x70   :  { %489 = vmatmul.mubr.f32.gmra.mrb[6].mxu1 %v57_v15 }
 0x11d   :  { %v547_v16 = vpop.f32.mrb[0].mxu0 }
 0x11e   :  { %v548_v18 = vpop.f32.mrb[1].mxu0 }
 0x11f   :  { %v585_v19 = vpop.f32.mrb[0].mxu1  ;;  %v549_v20 = vadd.f32 %v548_v18, %v547_v16 }
 0x120   :  { %v586_v21 = vpop.f32.mrb[1].mxu1 }
 0x121   :  { %v587_v22 = vadd.f32 %v586_v21, %v585_v19  ;;  %v261_v23 = vadd.f32 %v549_v20, %v514_v17  ;;  %v550_v25 = vpop.f32.mrb[2].mxu0 }
 0x122   :  { %v551_v26 = vpop.f32.mrb[3].mxu0 }
 0x123   :  { %v336_v24 = vadd.f32 %v587_v22, %v261_v23  ;;  %v588_v27 = vpop.f32.mrb[2].mxu1  ;;  %v552_v28 = vadd.f32 %v551_v26, %v550_v25 }
 0x124   :  { %v589_v29 = vpop.f32.mrb[3].mxu1 }
 0x125   :  { %v590_v30 = vadd.f32 %v589_v29, %v588_v27  ;;  %v266_v31 = vadd.f32 %v552_v28, %v514_v17 }
 0x127   :  { %v341_v32 = vadd.f32 %v590_v30, %v266_v31 }
 0x13d   :  { %v623_v33 = vpop.f32.mrb[4].mxu0 }
 0x13e   :  { %v624_v34 = vpop.f32.mrb[5].mxu0 }
 0x13f   :  { %v661_v35 = vpop.f32.mrb[4].mxu1  ;;  %v625_v36 = vadd.f32 %v624_v34, %v623_v33 }
 0x140   :  { %v662_v37 = vpop.f32.mrb[5].mxu1 }
 0x141   :  { %v663_v38 = vadd.f32 %v662_v37, %v661_v35  ;;  %v411_v39 = vadd.f32 %v625_v36, %v336_v24  ;;  %v626_v40 = vpop.f32.mrb[6].mxu0 }
 0x142   :  { %v627_v41 = vpop.f32.mrb[7].mxu0 }
 0x143   :  { %v664_v42 = vpop.f32.mrb[6].mxu1  ;;  %v486_v43 = vadd.f32 %v663_v38, %v411_v39  ;;  %v628_v44 = vadd.f32 %v627_v41, %v626_v40 }
 0x144   :  { %v665_v45 = vpop.f32.mrb[7].mxu1 }
 0x145   :  { %v666_v46 = vadd.f32 %v665_v45, %v664_v42  ;;  %494 = vst [vmem:[#allocation7] sm:$0xff] %v486_v43  ;;  %v416_v47 = vadd.f32 %v628_v44, %v341_v32 }
 0x147   :  { %v491_v48 = vadd.f32 %v666_v46, %v416_v47 }
 0x149   :  { %495 = vst [vmem:[#allocation7 + $0x8] sm:$0xff] %v491_v48 }
 0x14a   :  { %857 = shalt.err (!%p854_p6)
}
 0x14b   :  { %s858_s17 = scalar_lea.hbm %s949_s3, 256 }
 0x14c   :  { %p859_p7 = scmp.ne.s32.totalorder %s949_s3, %s858_s17  ;;  %p862_p8 = scmp.lt.u32.totalorder %s858_s17, %s949_s3 }
 0x14e   :  { %p864_p9 = pnand %p862_p8, %p859_p7 }
 0x150   :  { %867 = shalt.err (!%p864_p9)
}
 0x151   :  { %507 = dma.vmem_to_hbm [thread:$0]  %s502_s13, 256, %s949_s3, [#allocation4], %s878_s0, %s878_s0, %s879_s9  }
 0x152   :  { %872 = dma.done.wait [#allocation4], 256  }
 0x153   :  { %873 = vsyncadd [#allocation4], 4294967040 }
 0x154   :  { %511 = vsyncpa [#allocation3], 1 }
 0x155   :  { %512 = vsyncpa [#allocation6], 1 }
 0x156   :  { %513 = vsyncpa [#allocation4], 1 }

</bundles_post_ra>
